<compile_context>
chip_gen: v7x
topology: tpu7x:2x2x1
jax: 0.10.0
libtpu: 0.0.40
codegen_flags: <defaults>
</compile_context>

<pallas_src>
import functools

import jax
import jax.numpy as jnp
from jax.experimental import pallas as pl
from jax.experimental.pallas import tpu as pltpu

_MASK_VAL = -9000000000000000.0          # matches the torch zero_vec constant
_VMEM_LIMIT = 48 * 1024 * 1024           # headroom under v7x 64 MiB physical VMEM


def _row_tile(n, target):
    """Largest tile <= target that evenly divides n; full dim when n is small."""
    if n <= target:
        return n
    t = target
    while t >= 8:
        if n % t == 0:
            return t
        t //= 2
    return n


# ----------------------------------------------------------------------------
# Kernel 1: row-tiled linear projection  y = x @ W^T  (weight VMEM-resident).
# Kept in f32: this projection feeds the distance/median computation, which is
# sensitive to rounding of individual distances.
# ----------------------------------------------------------------------------
def _linear_kernel(x_ref, wt_ref, o_ref):
    o_ref[...] = jax.lax.dot_general(
        x_ref[...], wt_ref[...],
        dimension_numbers=(((1,), (0,)), ((), ())),
        preferred_element_type=jnp.float32)


def linear_rowtiled(x, wt, *, tile=512):
    rows, in_f = x.shape
    out_f = wt.shape[1]
    tm = _row_tile(rows, tile)
    return pl.pallas_call(
        _linear_kernel,
        out_shape=jax.ShapeDtypeStruct((rows, out_f), jnp.float32),
        grid=(rows // tm,),
        in_specs=[pl.BlockSpec((tm, in_f), lambda i: (i, 0)),
                  pl.BlockSpec((in_f, out_f), lambda i: (0, 0))],   # weight resident
        out_specs=pl.BlockSpec((tm, out_f), lambda i: (i, 0)),
        compiler_params=pltpu.CompilerParams(
            dimension_semantics=("parallel",), vmem_limit_bytes=_VMEM_LIMIT),
    )(jnp.asarray(x, jnp.float32), jnp.asarray(wt, jnp.float32))


# ----------------------------------------------------------------------------
# Kernel 2: pairwise squared euclidean distances via the Gram matrix (MXU)
#   D[i, j] = ||q_i||^2 + ||q_j||^2 - 2 * q_i . q_j
# ----------------------------------------------------------------------------
def _pdist_kernel(qi_ref, qall_ref, rn_row_ref, o_ref):
    qi = qi_ref[...]                                                 # (TI, d)
    g = jax.lax.dot_general(qi, qall_ref[...],
                            dimension_numbers=(((1,), (1,)), ((), ())),
                            preferred_element_type=jnp.float32)      # (TI, n)
    ri = jnp.sum(qi * qi, axis=1, keepdims=True)                     # (TI, 1)
    o_ref[...] = jnp.maximum(ri + rn_row_ref[...] - 2.0 * g, 0.0)


def pairwise_sqdist(q, *, tile=256):
    n, d = q.shape
    ti = _row_tile(n, tile)
    # Row norms as a (1, n) row computed once in the wrapper (O(n*d) glue);
    # avoids an in-kernel (n,1)->(1,n) transpose/relayout.
    rn_row = jnp.sum(q * q, axis=1)[None, :]
    return pl.pallas_call(
        _pdist_kernel,
        out_shape=jax.ShapeDtypeStruct((n, n), jnp.float32),
        grid=(n // ti,),
        in_specs=[pl.BlockSpec((ti, d), lambda i: (i, 0)),
                  pl.BlockSpec((n, d), lambda i: (0, 0)),      # full q resident
                  pl.BlockSpec((1, n), lambda i: (0, 0))],     # row norms resident
        out_specs=pl.BlockSpec((ti, n), lambda i: (i, 0)),
        compiler_params=pltpu.CompilerParams(
            dimension_semantics=("parallel",), vmem_limit_bytes=_VMEM_LIMIT),
    )(q, q, rn_row)


# ----------------------------------------------------------------------------
# Hyperedge weights (JAX glue):
#   w(e) = 1/(k(k-1)) * sum_{u<v in e} exp(-d_uv / median(d)^2), 0 if k < 2.
# The median is a selection (count-threshold binary search), not a full sort.
# TODO(synk): per-edge variable-size pair-set median has no clean Pallas
#             equivalent; it stays in plain JAX (the O(n^2 d) distance work is
#             done in the Pallas Gram kernel above).
# ----------------------------------------------------------------------------
def _masked_lower_median(D, pair_mask, num_pairs):
    """Lower median (torch.median semantics) of D[pair_mask] without sorting."""
    r = jnp.maximum((num_pairs - 1) // 2, 0)          # 0-indexed rank of lower median
    hi = jnp.max(jnp.where(pair_mask, D, -jnp.inf))
    lo = jnp.float32(-1.0)                            # distances are >= 0

    def body(_, carry):
        lo, hi = carry
        mid = 0.5 * (lo + hi)
        cnt = jnp.sum(jnp.where(pair_mask & (D <= mid), 1, 0))
        take_hi = cnt >= r + 1
        return jnp.where(take_hi, lo, mid), jnp.where(take_hi, mid, hi)

    lo, hi = jax.lax.fori_loop(0, 40, body, (lo, hi))
    # Smallest masked value strictly above lo == the rank-r order statistic.
    return jnp.min(jnp.where(pair_mask & (D > lo), D, jnp.inf))


def hyperedge_weights(D, adj):
    n = adj.shape[0]
    iu = jnp.triu(jnp.ones((n, n), dtype=bool), k=1)

    def per_edge(h_col):
        member = h_col > 0                                   # (n,)
        kf = jnp.sum(member.astype(jnp.float32))
        pair_mask = member[:, None] & member[None, :] & iu   # u < v pairs in edge
        p = jnp.sum(pair_mask.astype(jnp.int32))
        med = _masked_lower_median(D, pair_mask, p)
        sigma2 = med * med
        # NOTE: sigma == 0 (duplicate projected features) gives NaN, same as the
        # torch reference (which asserts); not special-cased here.
        terms = jnp.where(pair_mask, jnp.exp(-D / sigma2), 0.0)
        w = jnp.sum(terms) / (kf * (kf - 1.0))
        return jnp.where(kf < 2.0, jnp.float32(0.0), w)

    return jax.vmap(per_edge, in_axes=1)(adj)   # (n_edges,)


# ----------------------------------------------------------------------------
# Kernel 3: fused k/v projection + masked multi-head attention, q-row-tiled.
# Heads are column slices of the 2-D (rows, H*dim) operands; the output tile is
# assembled in vregs and written once as a lane-dense (tq, H*dv) slab.
# ----------------------------------------------------------------------------
def _fused_attn_kernel(q_ref, x2_ref, x3_ref, wkT_ref, wvT_ref, adj_ref, ew_ref,
                       o_ref, *, head_size, att_dim, dv):
    # k / v projections: recomputed per q-tile; x2/x3/weights/ew have constant
    # block indices so they remain VMEM-resident across grid steps.
    k = jax.lax.dot_general(x2_ref[...].astype(jnp.bfloat16), wkT_ref[...],
                            dimension_numbers=(((1,), (0,)), ((), ())),
                            preferred_element_type=jnp.float32)   # (n_e, qk); scale folded in
    v = jax.lax.dot_general(x3_ref[...].astype(jnp.bfloat16), wvT_ref[...],
                            dimension_numbers=(((1,), (0,)), ((), ())),
                            preferred_element_type=jnp.float32)   # (n_e, v_dim)
    vw = (ew_ref[...] * v).astype(jnp.bfloat16)                   # edge-weighted v, once per tile
    kb = k.astype(jnp.bfloat16)
    q = q_ref[...].astype(jnp.bfloat16)                           # (TQ, qk)
    mask = adj_ref[...].astype(jnp.float32) > 0.0                 # int8 adj -> bool (TQ, n_e)

    outs = []
    for h in range(head_size):   # static unroll over heads (column slices)
        qh = q[:, h * att_dim:(h + 1) * att_dim]                  # (TQ, att_dim)
        kh = kb[:, h * att_dim:(h + 1) * att_dim]                 # (n_e, att_dim)
        s = jax.lax.dot_general(qh, kh,
                                dimension_numbers=(((1,), (1,)), ((), ())),
                                preferred_element_type=jnp.float32)   # (TQ, n_e)
        s = jnp.where(mask, s, _MASK_VAL)
        m = jnp.max(s, axis=-1, keepdims=True)
        e = jnp.exp(s - m)
        p = e * pl.reciprocal(jnp.sum(e, axis=-1, keepdims=True), approx=True)
        outs.append(jax.lax.dot_general(p.astype(jnp.bfloat16),
                                        vw[:, h * dv:(h + 1) * dv],
                                        dimension_numbers=(((1,), (0,)), ((), ())),
                                        preferred_element_type=jnp.float32))  # (TQ, dv)
    o_ref[...] = outs[0] if head_size == 1 else jnp.concatenate(outs, axis=1)


def fused_kv_attention(q, x2, x3, wkT, wvT, adj_i8, ew, *, head_size, tile=256):
    n_q, qk_dim = q.shape
    n_e, in_f = x2.shape
    v_dim = wvT.shape[1]
    att_dim = qk_dim // head_size
    dv = v_dim // head_size
    tq = _row_tile(n_q, tile)
    kernel = functools.partial(_fused_attn_kernel, head_size=head_size,
                               att_dim=att_dim, dv=dv)
    return pl.pallas_call(
        kernel,
        out_shape=jax.ShapeDtypeStruct((n_q, v_dim), jnp.float32),
        grid=(n_q // tq,),
        in_specs=[
            pl.BlockSpec((tq, qk_dim), lambda i: (i, 0)),     # q tile
            pl.BlockSpec((n_e, in_f), lambda i: (0, 0)),      # x2 (resident)
            pl.BlockSpec((n_e, in_f), lambda i: (0, 0)),      # x3 (resident)
            pl.BlockSpec((in_f, qk_dim), lambda i: (0, 0)),   # Wk^T * scale (bf16)
            pl.BlockSpec((in_f, v_dim), lambda i: (0, 0)),    # Wv^T (bf16)
            pl.BlockSpec((tq, n_e), lambda i: (i, 0)),        # adj tile (int8)
            pl.BlockSpec((n_e, 1), lambda i: (0, 0)),         # edge weights
        ],
        out_specs=pl.BlockSpec((tq, v_dim), lambda i: (i, 0)),   # lane-dense (n_q, H*dv)
        compiler_params=pltpu.CompilerParams(
            dimension_semantics=("parallel",), vmem_limit_bytes=_VMEM_LIMIT),
    )(q, jnp.asarray(x2, jnp.float32), jnp.asarray(x3, jnp.float32),
      wkT, wvT, adj_i8, ew)


# ----------------------------------------------------------------------------
# FeaTrans forward
# ----------------------------------------------------------------------------
def featrans_forward(x1, x2, x3, edge_index, edge_attr, Wq, Wk, Wv, head_size):
    # NOTE: leaky_relu / dropout / layer_norm / self.weight / self.bias of the
    # torch FeaTrans module are never used in its forward(); omitted here.
    del edge_attr  # recomputed inside Self_Attention, matching the torch code

    qk_dim = Wq.shape[0]
    att_dim = qk_dim // head_size
    scale = float(att_dim) ** (-0.5)

    # adj as int8: 4x less HBM/VMEM traffic for the mask operand.
    adj_i8 = (jnp.asarray(edge_index) > 0).astype(jnp.int8)

    # One-time weight transforms at trace time: transpose for x @ W.T, fold the
    # softmax scale into Wk (q stays unscaled for the distance computation, as
    # in the torch reference), cast k/v weights to bf16 for the MXU.
    wqT = jnp.asarray(Wq, jnp.float32).T                       # f32 (feeds distances)
    wkT = (jnp.asarray(Wk, jnp.float32) * scale).T.astype(jnp.bfloat16)
    wvT = jnp.asarray(Wv, jnp.float32).T.astype(jnp.bfloat16)

    # q projection (Pallas row-tiled matmul); feeds both the hyperedge-weight
    # distances and the attention kernel.
    q = linear_rowtiled(x1, wqT)                         # (n_q, qk_dim) f32

    # Hyperedge weights from pairwise distances of projected q features.
    D = pairwise_sqdist(q)                               # (n_q, n_q)
    ew = hyperedge_weights(D, adj_i8)[:, None]           # (n_e, 1) == edge_attr.T

    # Fused k/v projection + masked multi-head attention.
    return fused_kv_attention(q, x2, x3, wkT, wvT, adj_i8, ew, head_size=head_size)


# ----------------------------------------------------------------------------
# Driver
# ----------------------------------------------------------------------------
if __name__ == "__main__":
    key = jax.random.PRNGKey(0)
    ks = jax.random.split(key, 8)

    in_features, qk_dim, v_dim, head_size = 16, 16, 16, 2
    n_nodes, n_edges = 8, 16

    x1 = jax.random.normal(ks[0], (n_nodes, in_features), jnp.float32)
    x2 = jax.random.normal(ks[1], (n_edges, in_features), jnp.float32)
    x3 = jax.random.normal(ks[2], (n_edges, in_features), jnp.float32)
    edge_index = (jax.random.uniform(ks[3], (n_nodes, n_edges)) > 0.5).astype(jnp.float32)
    edge_attr = jnp.zeros((n_edges, 1), jnp.float32)   # unused (recomputed), as in torch

    # nn.Linear weight shape = (out, in)
    Wq = jax.random.normal(ks[4], (qk_dim, in_features), jnp.float32) / jnp.sqrt(in_features)
    Wk = jax.random.normal(ks[5], (qk_dim, in_features), jnp.float32) / jnp.sqrt(in_features)
    Wv = jax.random.normal(ks[6], (v_dim, in_features), jnp.float32) / jnp.sqrt(in_features)

    fwd = jax.jit(featrans_forward, static_argnames=("head_size",))
    out = fwd(x1, x2, x3, edge_index, edge_attr, Wq, Wk, Wv, head_size=head_size)
    out = jax.block_until_ready(out)

    assert out.shape == (n_nodes, v_dim), out.shape
    assert bool(jnp.all(jnp.isfinite(out)))
    print("KERNEL_OK")
</pallas_src>

<mosaic_0001>
module attributes {stable_mosaic.version = 11 : i64} {
  func.func @_linear_kernel(%arg0: i32, %arg1: memref<8x16xf32, #tpu.memory_space<vmem>>, %arg2: memref<16x16xf32, #tpu.memory_space<vmem>>, %arg3: memref<8x16xf32, #tpu.memory_space<vmem>>) attributes {dimension_semantics = [#tpu.dimension_semantics<parallel>], iteration_bounds = array<i64: 1>, scalar_prefetch = 0 : i64, scratch_operands = 0 : i64, tpu.core_type = #tpu.core_type<tc>, window_params = [{transform_indices = @transform_0, window_bounds = array<i64: 8, 16>}, {pipeline_mode = #tpu.pipeline_mode<synchronous>, transform_indices = @transform_1, window_bounds = array<i64: 16, 16>}, {transform_indices = @transform_2, window_bounds = array<i64: 8, 16>}]} {
    %c0 = arith.constant 0 : index
    %c0_0 = arith.constant 0 : index
    %0 = vector.load %arg1[%c0, %c0_0] : memref<8x16xf32, #tpu.memory_space<vmem>>, vector<8x16xf32>
    %c0_1 = arith.constant 0 : index
    %c0_2 = arith.constant 0 : index
    %1 = vector.load %arg2[%c0_1, %c0_2] : memref<16x16xf32, #tpu.memory_space<vmem>>, vector<16x16xf32>
    %cst = arith.constant dense<0.000000e+00> : vector<8x16xf32>
    %2 = tpu.matmul %0, %1, %cst {dimension_numbers = #tpu.dot_dimension_numbers<[1], [0], [0], [1], [0, 0, 1, 1], [], []>} : vector<8x16xf32>, vector<16x16xf32>, vector<8x16xf32> -> vector<8x16xf32>
    %c0_3 = arith.constant 0 : index
    %c0_4 = arith.constant 0 : index
    %3 = vector.load %arg3[%c0_3, %c0_4] : memref<8x16xf32, #tpu.memory_space<vmem>>, vector<8x16xf32>
    tpu.vector_store %arg3[%c0_3, %c0_4], %2 {strides = array<i32>} : memref<8x16xf32, #tpu.memory_space<vmem>>, vector<8x16xf32>,
    return
  }
  func.func @transform_0(%arg0: i32) -> (i32, i32) {
    %c0_i32 = arith.constant 0 : i32
    %c0_i32_0 = arith.constant 0 : i32
    return %arg0, %c0_i32 : i32, i32
  }
  func.func @transform_1(%arg0: i32) -> (i32, i32) {
    %c0_i32 = arith.constant 0 : i32
    %c0_i32_0 = arith.constant 0 : i32
    %c0_i32_1 = arith.constant 0 : i32
    return %c0_i32, %c0_i32_0 : i32, i32
  }
  func.func @transform_2(%arg0: i32) -> (i32, i32) {
    %c0_i32 = arith.constant 0 : i32
    %c0_i32_0 = arith.constant 0 : i32
    return %arg0, %c0_i32 : i32, i32
  }
}

module attributes {stable_mosaic.version = 11 : i64} {
  func.func @_pdist_kernel(%arg0: i32, %arg1: memref<8x16xf32, #tpu.memory_space<vmem>>, %arg2: memref<8x16xf32, #tpu.memory_space<vmem>>, %arg3: memref<1x8xf32, #tpu.memory_space<vmem>>, %arg4: memref<8x8xf32, #tpu.memory_space<vmem>>) attributes {dimension_semantics = [#tpu.dimension_semantics<parallel>], iteration_bounds = array<i64: 1>, scalar_prefetch = 0 : i64, scratch_operands = 0 : i64, tpu.core_type = #tpu.core_type<tc>, window_params = [{transform_indices = @transform_0, window_bounds = array<i64: 8, 16>}, {pipeline_mode = #tpu.pipeline_mode<synchronous>, transform_indices = @transform_1, window_bounds = array<i64: 8, 16>}, {pipeline_mode = #tpu.pipeline_mode<synchronous>, transform_indices = @transform_2, window_bounds = array<i64: 1, 8>}, {transform_indices = @transform_3, window_bounds = array<i64: 8, 8>}]} {
    %c0 = arith.constant 0 : index
    %c0_0 = arith.constant 0 : index
    %0 = vector.load %arg1[%c0, %c0_0] : memref<8x16xf32, #tpu.memory_space<vmem>>, vector<8x16xf32>
    %c0_1 = arith.constant 0 : index
    %c0_2 = arith.constant 0 : index
    %1 = vector.load %arg2[%c0_1, %c0_2] : memref<8x16xf32, #tpu.memory_space<vmem>>, vector<8x16xf32>
    %cst = arith.constant dense<0.000000e+00> : vector<8x8xf32>
    %2 = tpu.matmul %0, %1, %cst {dimension_numbers = #tpu.dot_dimension_numbers<[1], [1], [0], [0], [0, 0, 1, 0], [], []>} : vector<8x16xf32>, vector<8x16xf32>, vector<8x8xf32> -> vector<8x8xf32>
    %3 = arith.mulf %0, %0 : vector<8x16xf32>
    %cst_3 = arith.constant dense<0.000000e+00> : vector<8xf32>
    %4 = vector.multi_reduction <add>, %3, %cst_3 [1] : vector<8x16xf32> to vector<8xf32>
    %5 = vector.shape_cast %4 : vector<8xf32> to vector<8x1xf32>
    %c0_4 = arith.constant 0 : index
    %c0_5 = arith.constant 0 : index
    %6 = vector.load %arg3[%c0_4, %c0_5] : memref<1x8xf32, #tpu.memory_space<vmem>>, vector<1x8xf32>
    %7 = vector.broadcast %5 : vector<8x1xf32> to vector<8x8xf32>
    %8 = vector.broadcast %6 : vector<1x8xf32> to vector<8x8xf32>
    %9 = arith.addf %7, %8 : vector<8x8xf32>
    %cst_6 = arith.constant 2.000000e+00 : f32
    %10 = vector.broadcast %cst_6 : f32 to vector<8x8xf32>
    %11 = arith.mulf %10, %2 : vector<8x8xf32>
    %12 = arith.subf %9, %11 : vector<8x8xf32>
    %cst_7 = arith.constant 0.000000e+00 : f32
    %13 = vector.broadcast %cst_7 : f32 to vector<8x8xf32>
    %14 = arith.maximumf %12, %13 : vector<8x8xf32>
    %c0_8 = arith.constant 0 : index
    %c0_9 = arith.constant 0 : index
    %15 = vector.load %arg4[%c0_8, %c0_9] : memref<8x8xf32, #tpu.memory_space<vmem>>, vector<8x8xf32>
    tpu.vector_store %arg4[%c0_8, %c0_9], %14 {strides = array<i32>} : memref<8x8xf32, #tpu.memory_space<vmem>>, vector<8x8xf32>,
    return
  }
  func.func @transform_0(%arg0: i32) -> (i32, i32) {
    %c0_i32 = arith.constant 0 : i32
    %c0_i32_0 = arith.constant 0 : i32
    return %arg0, %c0_i32 : i32, i32
  }
  func.func @transform_1(%arg0: i32) -> (i32, i32) {
    %c0_i32 = arith.constant 0 : i32
    %c0_i32_0 = arith.constant 0 : i32
    %c0_i32_1 = arith.constant 0 : i32
    return %c0_i32, %c0_i32_0 : i32, i32
  }
  func.func @transform_2(%arg0: i32) -> (i32, i32) {
    %c0_i32 = arith.constant 0 : i32
    %c0_i32_0 = arith.constant 0 : i32
    %c0_i32_1 = arith.constant 0 : i32
    return %c0_i32, %c0_i32_0 : i32, i32
  }
  func.func @transform_3(%arg0: i32) -> (i32, i32) {
    %c0_i32 = arith.constant 0 : i32
    %c0_i32_0 = arith.constant 0 : i32
    return %arg0, %c0_i32 : i32, i32
  }
}

module attributes {stable_mosaic.version = 11 : i64} {
  func.func @_fused_attn_kernel(%arg0: i32, %arg1: memref<8x16xf32, #tpu.memory_space<vmem>>, %arg2: memref<16x16xf32, #tpu.memory_space<vmem>>, %arg3: memref<16x16xf32, #tpu.memory_space<vmem>>, %arg4: memref<16x16xbf16, #tpu.memory_space<vmem>>, %arg5: memref<16x16xbf16, #tpu.memory_space<vmem>>, %arg6: memref<8x16xi8, #tpu.memory_space<vmem>>, %arg7: memref<16x1xf32, #tpu.memory_space<vmem>>, %arg8: memref<8x16xf32, #tpu.memory_space<vmem>>) attributes {dimension_semantics = [#tpu.dimension_semantics<parallel>], iteration_bounds = array<i64: 1>, scalar_prefetch = 0 : i64, scratch_operands = 0 : i64, tpu.core_type = #tpu.core_type<tc>, window_params = [{transform_indices = @transform_0, window_bounds = array<i64: 8, 16>}, {pipeline_mode = #tpu.pipeline_mode<synchronous>, transform_indices = @transform_1, window_bounds = array<i64: 16, 16>}, {pipeline_mode = #tpu.pipeline_mode<synchronous>, transform_indices = @transform_2, window_bounds = array<i64: 16, 16>}, {pipeline_mode = #tpu.pipeline_mode<synchronous>, transform_indices = @transform_3, window_bounds = array<i64: 16, 16>}, {pipeline_mode = #tpu.pipeline_mode<synchronous>, transform_indices = @transform_4, window_bounds = array<i64: 16, 16>}, {transform_indices = @transform_5, window_bounds = array<i64: 8, 16>}, {pipeline_mode = #tpu.pipeline_mode<synchronous>, transform_indices = @transform_6, window_bounds = array<i64: 16, 1>}, {transform_indices = @transform_7, window_bounds = array<i64: 8, 16>}]} {
    %c0 = arith.constant 0 : index
    %c0_0 = arith.constant 0 : index
    %0 = vector.load %arg2[%c0, %c0_0] : memref<16x16xf32, #tpu.memory_space<vmem>>, vector<16x16xf32>
    %1 = arith.truncf %0 : vector<16x16xf32> to vector<16x16xbf16>
    %c0_1 = arith.constant 0 : index
    %c0_2 = arith.constant 0 : index
    %2 = vector.load %arg4[%c0_1, %c0_2] : memref<16x16xbf16, #tpu.memory_space<vmem>>, vector<16x16xbf16>
    %cst = arith.constant dense<0.000000e+00> : vector<16x16xf32>
    %3 = tpu.matmul %1, %2, %cst {dimension_numbers = #tpu.dot_dimension_numbers<[1], [0], [0], [1], [0, 0, 1, 1], [], []>} : vector<16x16xbf16>, vector<16x16xbf16>, vector<16x16xf32> -> vector<16x16xf32>
    %c0_3 = arith.constant 0 : index
    %c0_4 = arith.constant 0 : index
    %4 = vector.load %arg3[%c0_3, %c0_4] : memref<16x16xf32, #tpu.memory_space<vmem>>, vector<16x16xf32>
    %5 = arith.truncf %4 : vector<16x16xf32> to vector<16x16xbf16>
    %c0_5 = arith.constant 0 : index
    %c0_6 = arith.constant 0 : index
    %6 = vector.load %arg5[%c0_5, %c0_6] : memref<16x16xbf16, #tpu.memory_space<vmem>>, vector<16x16xbf16>
    %cst_7 = arith.constant dense<0.000000e+00> : vector<16x16xf32>
    %7 = tpu.matmul %5, %6, %cst_7 {dimension_numbers = #tpu.dot_dimension_numbers<[1], [0], [0], [1], [0, 0, 1, 1], [], []>} : vector<16x16xbf16>, vector<16x16xbf16>, vector<16x16xf32> -> vector<16x16xf32>
    %c0_8 = arith.constant 0 : index
    %c0_9 = arith.constant 0 : index
    %8 = vector.load %arg7[%c0_8, %c0_9] : memref<16x1xf32, #tpu.memory_space<vmem>>, vector<16x1xf32>
    %9 = vector.broadcast %8 : vector<16x1xf32> to vector<16x16xf32>
    %10 = arith.mulf %9, %7 : vector<16x16xf32>
    %11 = arith.truncf %10 : vector<16x16xf32> to vector<16x16xbf16>
    %12 = arith.truncf %3 : vector<16x16xf32> to vector<16x16xbf16>
    %c0_10 = arith.constant 0 : index
    %c0_11 = arith.constant 0 : index
    %13 = vector.load %arg1[%c0_10, %c0_11] : memref<8x16xf32, #tpu.memory_space<vmem>>, vector<8x16xf32>
    %14 = arith.truncf %13 : vector<8x16xf32> to vector<8x16xbf16>
    %c0_12 = arith.constant 0 : index
    %c0_13 = arith.constant 0 : index
    %15 = vector.load %arg6[%c0_12, %c0_13] : memref<8x16xi8, #tpu.memory_space<vmem>>, vector<8x16xi8>
    %16 = arith.sitofp %15 : vector<8x16xi8> to vector<8x16xf32>
    %cst_14 = arith.constant 0.000000e+00 : f32
    %17 = vector.broadcast %cst_14 : f32 to vector<8x16xf32>
    %18 = arith.cmpf ogt, %16, %17 : vector<8x16xf32>
    %19 = vector.extract_strided_slice %14 {offsets = [0, 0], sizes = [8, 8], strides = [1, 1]} : vector<8x16xbf16> to vector<8x8xbf16>
    %20 = vector.extract_strided_slice %12 {offsets = [0, 0], sizes = [16, 8], strides = [1, 1]} : vector<16x16xbf16> to vector<16x8xbf16>
    %cst_15 = arith.constant dense<0.000000e+00> : vector<8x16xf32>
    %21 = tpu.matmul %19, %20, %cst_15 {dimension_numbers = #tpu.dot_dimension_numbers<[1], [1], [0], [0], [0, 0, 1, 0], [], []>} : vector<8x8xbf16>, vector<16x8xbf16>, vector<8x16xf32> -> vector<8x16xf32>
    %cst_16 = arith.constant -9.000000e+15 : f32
    %22 = vector.broadcast %cst_16 : f32 to vector<8x16xf32>
    %23 = arith.select %18, %21, %22 : vector<8x16xi1>, vector<8x16xf32>
    %cst_17 = arith.constant dense<0xFF800000> : vector<8xf32>
    %24 = vector.multi_reduction <maximumf>, %23, %cst_17 [1] : vector<8x16xf32> to vector<8xf32>
    %25 = vector.shape_cast %24 : vector<8xf32> to vector<8x1xf32>
    %26 = vector.broadcast %25 : vector<8x1xf32> to vector<8x16xf32>
    %27 = arith.subf %23, %26 : vector<8x16xf32>
    %28 = math.exp %27 : vector<8x16xf32>
    %cst_18 = arith.constant dense<0.000000e+00> : vector<8xf32>
    %29 = vector.multi_reduction <add>, %28, %cst_18 [1] : vector<8x16xf32> to vector<8xf32>
    %30 = vector.shape_cast %29 : vector<8xf32> to vector<8x1xf32>
    %31 = tpu.reciprocal %30 {approx = true} : vector<8x1xf32> -> vector<8x1xf32>
    %32 = vector.broadcast %31 : vector<8x1xf32> to vector<8x16xf32>
    %33 = arith.mulf %28, %32 : vector<8x16xf32>
    %34 = arith.truncf %33 : vector<8x16xf32> to vector<8x16xbf16>
    %35 = vector.extract_strided_slice %11 {offsets = [0, 0], sizes = [16, 8], strides = [1, 1]} : vector<16x16xbf16> to vector<16x8xbf16>
    %cst_19 = arith.constant dense<0.000000e+00> : vector<8x8xf32>
    %36 = tpu.matmul %34, %35, %cst_19 {dimension_numbers = #tpu.dot_dimension_numbers<[1], [0], [0], [1], [0, 0, 1, 1], [], []>} : vector<8x16xbf16>, vector<16x8xbf16>, vector<8x8xf32> -> vector<8x8xf32>
    %37 = vector.extract_strided_slice %14 {offsets = [0, 8], sizes = [8, 8], strides = [1, 1]} : vector<8x16xbf16> to vector<8x8xbf16>
    %38 = vector.extract_strided_slice %12 {offsets = [0, 8], sizes = [16, 8], strides = [1, 1]} : vector<16x16xbf16> to vector<16x8xbf16>
    %cst_20 = arith.constant dense<0.000000e+00> : vector<8x16xf32>
    %39 = tpu.matmul %37, %38, %cst_20 {dimension_numbers = #tpu.dot_dimension_numbers<[1], [1], [0], [0], [0, 0, 1, 0], [], []>} : vector<8x8xbf16>, vector<16x8xbf16>, vector<8x16xf32> -> vector<8x16xf32>
    %cst_21 = arith.constant -9.000000e+15 : f32
    %40 = vector.broadcast %cst_21 : f32 to vector<8x16xf32>
    %41 = arith.select %18, %39, %40 : vector<8x16xi1>, vector<8x16xf32>
    %cst_22 = arith.constant dense<0xFF800000> : vector<8xf32>
    %42 = vector.multi_reduction <maximumf>, %41, %cst_22 [1] : vector<8x16xf32> to vector<8xf32>
    %43 = vector.shape_cast %42 : vector<8xf32> to vector<8x1xf32>
    %44 = vector.broadcast %43 : vector<8x1xf32> to vector<8x16xf32>
    %45 = arith.subf %41, %44 : vector<8x16xf32>
    %46 = math.exp %45 : vector<8x16xf32>
    %cst_23 = arith.constant dense<0.000000e+00> : vector<8xf32>
    %47 = vector.multi_reduction <add>, %46, %cst_23 [1] : vector<8x16xf32> to vector<8xf32>
    %48 = vector.shape_cast %47 : vector<8xf32> to vector<8x1xf32>
    %49 = tpu.reciprocal %48 {approx = true} : vector<8x1xf32> -> vector<8x1xf32>
    %50 = vector.broadcast %49 : vector<8x1xf32> to vector<8x16xf32>
    %51 = arith.mulf %46, %50 : vector<8x16xf32>
    %52 = arith.truncf %51 : vector<8x16xf32> to vector<8x16xbf16>
    %53 = vector.extract_strided_slice %11 {offsets = [0, 8], sizes = [16, 8], strides = [1, 1]} : vector<16x16xbf16> to vector<16x8xbf16>
    %cst_24 = arith.constant dense<0.000000e+00> : vector<8x8xf32>
    %54 = tpu.matmul %52, %53, %cst_24 {dimension_numbers = #tpu.dot_dimension_numbers<[1], [0], [0], [1], [0, 0, 1, 1], [], []>} : vector<8x16xbf16>, vector<16x8xbf16>, vector<8x8xf32> -> vector<8x8xf32>
    %55 = tpu.concatenate %36, %54 in 1 : vector<8x8xf32>, vector<8x8xf32> -> vector<8x16xf32>
    %c0_25 = arith.constant 0 : index
    %c0_26 = arith.constant 0 : index
    %56 = vector.load %arg8[%c0_25, %c0_26] : memref<8x16xf32, #tpu.memory_space<vmem>>, vector<8x16xf32>
    tpu.vector_store %arg8[%c0_25, %c0_26], %55 {strides = array<i32>} : memref<8x16xf32, #tpu.memory_space<vmem>>, vector<8x16xf32>,
    return
  }
  func.func @transform_0(%arg0: i32) -> (i32, i32) {
    %c0_i32 = arith.constant 0 : i32
    %c0_i32_0 = arith.constant 0 : i32
    return %arg0, %c0_i32 : i32, i32
  }
  func.func @transform_1(%arg0: i32) -> (i32, i32) {
    %c0_i32 = arith.constant 0 : i32
    %c0_i32_0 = arith.constant 0 : i32
    %c0_i32_1 = arith.constant 0 : i32
    return %c0_i32, %c0_i32_0 : i32, i32
  }
  func.func @transform_2(%arg0: i32) -> (i32, i32) {
    %c0_i32 = arith.constant 0 : i32
    %c0_i32_0 = arith.constant 0 : i32
    %c0_i32_1 = arith.constant 0 : i32
    return %c0_i32, %c0_i32_0 : i32, i32
  }
  func.func @transform_3(%arg0: i32) -> (i32, i32) {
    %c0_i32 = arith.constant 0 : i32
    %c0_i32_0 = arith.constant 0 : i32
    %c0_i32_1 = arith.constant 0 : i32
    return %c0_i32, %c0_i32_0 : i32, i32
  }
  func.func @transform_4(%arg0: i32) -> (i32, i32) {
    %c0_i32 = arith.constant 0 : i32
    %c0_i32_0 = arith.constant 0 : i32
    %c0_i32_1 = arith.constant 0 : i32
    return %c0_i32, %c0_i32_0 : i32, i32
  }
  func.func @transform_5(%arg0: i32) -> (i32, i32) {
    %c0_i32 = arith.constant 0 : i32
    %c0_i32_0 = arith.constant 0 : i32
    return %arg0, %c0_i32 : i32, i32
  }
  func.func @transform_6(%arg0: i32) -> (i32, i32) {
    %c0_i32 = arith.constant 0 : i32
    %c0_i32_0 = arith.constant 0 : i32
    %c0_i32_1 = arith.constant 0 : i32
    return %c0_i32, %c0_i32_0 : i32, i32
  }
  func.func @transform_7(%arg0: i32) -> (i32, i32) {
    %c0_i32 = arith.constant 0 : i32
    %c0_i32_0 = arith.constant 0 : i32
    return %arg0, %c0_i32 : i32, i32
  }
}

</mosaic_0001>

<bundles_post_ra>
// kernel: custom-call
= control target key start
LH: loop header
LB: loop body
LE: loop exit
PB: predicated region body
PF: predicated region fallthrough
CT: control target
= control target key end

     0   :  { %s6_s0 = inlined_call_operand.vmem [shape: f32[16], index: 0, kind: output, shape index: {}]  }

// kernel: featrans_forward.3
= control target key start
LH: loop header
LB: loop body
LE: loop exit
PB: predicated region body
PF: predicated region fallthrough
CT: control target
= control target key end

     0   :  { %v110_v0 = vmov 0.0|0.0   ;;  %vm111_vm0 = vmmov 0   ;;  %v112_v3 = vmov 0.0   ;;  %vm14_vm1 = vcmask 130048   ;;  %s140_s1 = inlined_call_operand.vmem [shape: f32[16,16], index: 1, kind: input, shape index: {}]   ;;  %s141_s0 = inlined_call_operand.vmem [shape: f32[8,16], index: 0, kind: input, shape index: {}]   ;;  %s142_s2 = inlined_call_operand.vmem [shape: f32[8,16], index: 2, kind: output, shape index: {}]  }
   0x1   :  { %104 = vmatprep.subr.bf16.mxu0 %v110_v0  ;;  %v12_v1 = vld [vmem:[%s140_s1] sm:$0xff]  ;;  %v13_v2 = vld [vmem:[%s140_s1 + $0x8] sm:$0xff]  ;;  %101 = vmatprep.mubr.msk.f32.mxu0 %vm111_vm0, %v112_v3 }
   0x2   :  { %v105_v4 = vpack.c.bf16 %v13_v2, %v12_v1  ;;  %v11_v5 = vld [vmem:[%s141_s0] sm:$0xff] }
   0x4   :  { %106 = vmatpush3.bf16.msra.mxu0 %v105_v4 }
   0x7   :  { %102 = vmatmul.mubr.msk.f32.vlgmr.msra.gmra.mrb[0].mxu0 %vm14_vm1, %v11_v5 }
  0xda   :  { %v84_v6 = vpop.f32.mrb[0].mxu0 }
  0xdb   :  { %88 = vst.msk [vmem:[%s142_s2] sm:$0xff] %vm14_vm1, %v84_v6  ;;  %v103_v7 = vpop.f32.mrb[1].mxu0 }

// kernel: featrans_forward.4
= control target key start
LH: loop header
LB: loop body
LE: loop exit
PB: predicated region body
PF: predicated region fallthrough
CT: control target
= control target key end

     0   :  { %vm16_vm0 = vcmask 130048   ;;  %v126_v0 = vmov 0.0   ;;  %vm127_vm1 = vmmov 0   ;;  %vm108_vm2 = vcmask 64512   ;;  %s160_s1 = inlined_call_operand.vmem [shape: f32[8,16], index: 1, kind: input, shape index: {}, may-alias: {0,1}]   ;;  %s161_s0 = inlined_call_operand.vmem [shape: f32[8,16], index: 0, kind: input, shape index: {}, may-alias: {0,1}]   ;;  %s162_s2 = inlined_call_operand.vmem [shape: f32[1,8], index: 2, kind: input, shape index: {}]   ;;  %s163_s3 = inlined_call_operand.vmem [shape: f32[8,8], index: 3, kind: output, shape index: {}]  }
   0x1   :  { %119 = vmatprep.subr.mxu0 %v126_v0  ;;  %v15_v1 = vld [vmem:[%s160_s1] sm:$0xff]  ;;  %121 = vmatprep.mubr.msk.f32.mxu0 %vm127_vm1, %v126_v0 }
   0x2   :  { %v14_v2 = vld [vmem:[%s161_s0] sm:$0xff]  ;;  %120 = vmatpush3.xpose.msk.msra.mxu0 %vm16_vm0, %v15_v1 }
   0x3   :  { %v93_v3 = vmul.f32 %v14_v2, %v14_v2  ;;  %v116_v6 = vld [vmem:[%s162_s2] ss:$0 sm:$0xff] }
   0x5   :  { %v94_v4 = vsel %vm16_vm0, %v93_v3, 0.0  ;;  %122 = vmatmul.mubr.msk.f32.vlgmr.msra.gmra.mrb[0].mxu0 %vm16_vm0, %v14_v2 }
   0x6   :  { %95 = vadd.xlane.f32.xlu0 %v94_v4 }
  0x93   :  { %v96_v5 = vpop.xlane.xlu0 %95 }
  0x94   :  { %v104_v7 = vadd.f32 %v116_v6, %v96_v5 }
  0xd8   :  { %v89_v8 = vpop.f32.mrb[0].mxu0 }
  0xd9   :  { %v105_v9 = vmul.f32 2.0, %v89_v8  ;;  %v123_v10 = vpop.f32.mrb[1].mxu0 }
  0xdb   :  { %v106_v11 = vsub.f32 %v104_v7, %v105_v9 }
  0xdd   :  { %v107_v12 = vmax.f32 %v106_v11, 0.0 }
  0xdf   :  { %109 = vst.msk [vmem:[%s163_s3] sm:$0xff] %vm108_vm2, %v107_v12 }

// kernel: mul.12
= control target key start
LH: loop header
LB: loop body
LE: loop exit
PB: predicated region body
PF: predicated region fallthrough
CT: control target
= control target key end

     0   :  { %s34_s0 = inlined_call_operand.vmem [shape: f32[16], index: 0, kind: input, shape index: {}, may-alias: {0,1}]   ;;  %s35_s1 = inlined_call_operand.vmem [shape: f32[16], index: 1, kind: input, shape index: {}, may-alias: {0,1}]   ;;  %s36_s2 = inlined_call_operand.vmem [shape: f32[16], index: 2, kind: output, shape index: {}]  }
   0x1   :  { %v3_v0 = vld [vmem:[%s34_s0] sm:$0x1] }
   0x2   :  { %v4_v1 = vld [vmem:[%s35_s1] sm:$0x1] }
   0x3   :  { %v7_v2 = vmul.f32 %v4_v1, %v3_v0 }
   0x5   :  { %9 = vst [vmem:[%s36_s2] sm:$0x1] %v7_v2 }

// kernel: neg.1
= control target key start
LH: loop header
LB: loop body
LE: loop exit
PB: predicated region body
PF: predicated region fallthrough
CT: control target
= control target key end

     0   :  { %s24_s0 = inlined_call_operand.vmem [shape: f32[8,8], index: 0, kind: input, shape index: {}]   ;;  %s25_s1 = inlined_call_operand.vmem [shape: f32[8,8], index: 1, kind: output, shape index: {}]  }
   0x1   :  { %v2_v0 = vld [vmem:[%s24_s0] sm:$0xff] }
   0x2   :  { %v5_v1 = vxor.u32 2147483648, %v2_v0 }
   0x4   :  { %7 = vst [vmem:[%s25_s1] sm:$0xff] %v5_v1 }

// kernel: featrans_forward.5
= control target key start
LH: loop header
LB: loop body
LE: loop exit
PB: predicated region body
PF: predicated region fallthrough
CT: control target
= control target key end

     0   :  { %v494_v1 = vmov 0.0   ;;  %vm495_vm0 = vmmov 0   ;;  %vm39_vm1 = vcmask 130048   ;;  %s617_s0 = inlined_call_operand.vmem [shape: f32[8,16], index: 0, kind: input, shape index: {}]   ;;  %s618_s1 = inlined_call_operand.vmem [shape: f32[16,16], index: 1, kind: input, shape index: {}]   ;;  %s619_s2 = inlined_call_operand.vmem [shape: f32[16,16], index: 2, kind: input, shape index: {}]   ;;  %s620_s3 = inlined_call_operand.vmem [shape: bf16[16,16], index: 3, kind: input, shape index: {}]   ;;  %s621_s4 = inlined_call_operand.vmem [shape: bf16[16,16], index: 4, kind: input, shape index: {}]   ;;  %s622_s5 = inlined_call_operand.vmem [shape: s8[8,16], index: 5, kind: input, shape index: {}]   ;;  %s623_s6 = inlined_call_operand.vmem [shape: f32[16,1], index: 6, kind: input, shape index: {}]   ;;  %s624_s7 = inlined_call_operand.hbm [shape: f32[8,16], index: 7, kind: output, shape index: {}]  }
   0x1   :  { %v460_v0 = vld [vmem:[%s620_s3] sm:$0xff]   ;;  %416 = vmatprep.subr.bf16.mxu0 %v494_v1  ;;  %v29_v3 = vld [vmem:[%s618_s1 + $0x8] sm:$0xff]  ;;  %422 = vmatprep.subr.bf16.mxu1 %v494_v1 }
   0x2   :  { %v28_v2 = vld [vmem:[%s618_s1] sm:$0xff]  ;;  %417 = vmatpush3.bf16.msra.mxu0 %v460_v0  ;;  %418 = vmatprep.mubr.msk.bf16.mxu0 %vm495_vm0, %v494_v1 }
   0x3   :  { %v30_v4 = vpack.c.bf16 %v29_v3, %v28_v2 }
   0x4   :  { %12 = vsyncpa [#allocation3], 0  ;;  %428 = vmatprep.subr.bf16.mxu0 %v494_v1  ;;  %424 = vmatprep.mubr.msk.bf16.mxu1 %vm495_vm0, %v494_v1  ;;  %vm161_vm2 = vcmask 64512   ;;  %v155_v8 = vld [vmem:[%s617_s0] sm:$0xff]  ;;  %s496_s30 = smov 120   ;;  %v85_v15 = vld [vmem:[%s619_s2 + $0x8] sm:$0xff] }
   0x5   :  { %419 = vmatmul.mubr.msk.bf16.vlgmr.msra.gmra.mrb[0].mxu0 %vm39_vm1, %v30_v4  ;;  %v156_v12 = vpack.c.bf16 %v155_v8, %v155_v8  ;;  %v461_v13 = vld [vmem:[%s621_s4] sm:$0xff]   ;;  %v497_v23 = vmov 0   ;;  %v140_v37 = vld [vmem:[%s623_s6 + $0x8] sm:$0xff]  ;;  %s499_s16 = smov [#allocation2]  }
   0x6   :  { %430 = vmatprep.mubr.msk.bf16.mxu0 %vm495_vm0, %v494_v1  ;;  %v84_v14 = vld [vmem:[%s619_s2] sm:$0xff]  ;;  %423 = vmatpush3.bf16.msra.mxu1 %v461_v13  ;;  %s388_s17 = sshll.u32 %s499_s16, 4  ;;  %s389_s17 = int_to_ptr.vmem [resolvable:$true] %s388_s17 }
   0x7   :  { %v86_v16 = vpack.c.bf16 %v85_v15, %v84_v14  ;;  %434 = vmatprep.subr.bf16.mxu1 %v494_v1  ;;  %v157_v20 = vld [vmem:[%s622_s5] sm:$0x3]  ;;  %458 = vset.pattern.permute.xlu0 %v497_v23  ;;  %s470_s18 = scalar_lea.vmem %s389_s17, 128  ;;  %p475_p1 = scmp.lt.s32.totalorder %s389_s17, %s389_s17 }
   0x8   :  { %v158_v21 = vunpack.c.0.s8 %v157_v20  ;;  %v139_v22 = vld [vmem:[%s623_s6] sm:$0xff]  ;;  %459 = vset.pattern.permute.xlu1 %v497_v23  ;;  %s498_s6 = smov 8   ;;  %p471_p0 = scmp.ne.s32.totalorder %s389_s17, %s470_s18 }
   0x9   :  { %425 = vmatmul.mubr.msk.bf16.vlgmr.msra.gmra.mrb[0].mxu1 %vm39_vm1, %v86_v16  ;;  %p476_p2 = scmp.lt.s32.totalorder %s470_s18, %s470_s18 }
   0xa   :  { %436 = vmatprep.mubr.msk.bf16.mxu1 %vm495_vm0, %v494_v1  ;;  %v159_v24 = vcvt.s32.f32 %v158_v21 }
   0xb   :  { %p477_p3 = por %p476_p2, %p475_p1 }
   0xc   :  { %vm160_vm3 = vcmp.gt.f32.partialorder %v159_v24, 0.0 }
   0xd   :  { %p478_p4 = pnand %p477_p3, %p471_p0 }
  0xd8   :  { %v77_v5 = vpop.f32.mrb[0].mxu0 }
  0xd9   :  { %v420_v6 = vpop.f32.mrb[1].mxu0 }
  0xda   :  { %v80_v7 = vpop.f32.mrb[2].mxu0 }
  0xdb   :  { %v154_v9 = vpack.c.bf16 %v80_v7, %v77_v5  ;;  %v421_v10 = vpop.f32.mrb[3].mxu0 }
  0xdc   :  { %v132_v41 = vpop.f32.mrb[0].mxu1 }
  0xdd   :  { %v166_v11 = vsel %vm161_vm2, %v154_v9, 0  ;;  %268 = vrot.lane.b32.xlu0 %v154_v9, %s496_s30  ;;  %v426_v42 = vpop.f32.mrb[1].mxu1 }
  0xde   :  { %429 = vmatpush3.bf16.xpose.msra.mxu0 %v166_v11  ;;  %v135_v45 = vpop.f32.mrb[2].mxu1 }
  0xdf   :  { %440 = vmatprep.subr.bf16.mxu0 %v494_v1  ;;  %v427_v46 = vpop.f32.mrb[3].mxu1 }
  0xe1   :  { %265 = vrot.lane.b32.xlu0 %v156_v12, %s496_s30 }
  0xe5   :  { %431 = vmatmul.mubr.msk.bf16.vlgmr.msra.gmra.mrb[4].mxu0 %vm161_vm2, %v156_v12  ;;  %143 = vperm.xlu0 %458, %v139_v22  }
  0xe6   :  { %442 = vmatprep.mubr.msk.bf16.mxu0 %vm495_vm0, %v494_v1 }
 0x14f   :  { %v269_v17 = vpop.permute.xlu0 %268 }
 0x150   :  { %v274_v18 = vsel %vm161_vm2, %v269_v17, 0 }
 0x151   :  { %441 = vmatpush3.bf16.xpose.msra.mxu0 %v274_v18 }
 0x153   :  { %v266_v19 = vpop.permute.xlu0 %265 }
 0x158   :  { %443 = vmatmul.mubr.msk.bf16.vlgmr.msra.gmra.mrb[8].mxu0 %vm161_vm2, %v266_v19 }
 0x164   :  { %v144_v49 = vpop.permute.xlu0 %143 }
 0x165   :  { %v151_v51 = vmul.f32 %v144_v49, %v132_v41 }
 0x1b8   :  { %v202_v25 = vpop.f32.mrb[4].mxu0 }
 0x1b9   :  { %v208_v26 = vsel %vm160_vm3, %v202_v25, -9e+15  ;;  %v432_v27 = vpop.f32.mrb[5].mxu0 }
 0x1ba   :  { %v209_v28 = vsel %vm39_vm1, %v208_v26, -inf  ;;  %v205_v29 = vpop.f32.mrb[6].mxu0 }
 0x1bb   :  { %210 = vmax.xlane.f32.xlu1 %v209_v28  ;;  %v433_v30 = vpop.f32.mrb[7].mxu0 }
 0x22b   :  { %v310_v31 = vpop.f32.mrb[8].mxu0 }
 0x22c   :  { %v316_v32 = vsel %vm160_vm3, %v310_v31, -9e+15  ;;  %v444_v33 = vpop.f32.mrb[9].mxu0 }
 0x22d   :  { %v313_v34 = vpop.f32.mrb[10].mxu0  ;;  %v317_v35 = vsel %vm39_vm1, %v316_v32, -inf }
 0x22e   :  { %318 = vmax.xlane.f32.xlu1 %v317_v35  ;;  %v445_v36 = vpop.f32.mrb[11].mxu0 }
 0x23f   :  { %148 = vperm.xlu1 %459, %v140_v37  }
 0x248   :  { %v211_v38 = vpop.xlane.xlu1 %210 }
 0x249   :  { %v212_v39 = vsub.f32 %v208_v26, %v211_v38 }
 0x24b   :  { %v213_v40 = vmul.f32 1.442695, %v212_v39 }
 0x24d   :  { %462 = vpow2.f32 %v213_v40 }
 0x257   :  { %v463_v43 = vpop.eup %462 }
 0x258   :  { %v215_v44 = vsel %vm39_vm1, %v463_v43, 0.0 }
 0x259   :  { %216 = vadd.xlane.f32.xlu0 %v215_v44 }
 0x2bb   :  { %v319_v47 = vpop.xlane.xlu1 %318 }
 0x2bc   :  { %v320_v48 = vsub.f32 %v316_v32, %v319_v47 }
 0x2be   :  { %v321_v50 = vmul.f32 1.442695, %v320_v48 }
 0x2bf   :  { %v149_v52 = vpop.permute.xlu1 %148 }
 0x2c0   :  { %464 = vpow2.f32 %v321_v50  ;;  %v152_v53 = vmul.f32 %v149_v52, %v135_v45 }
 0x2c2   :  { %v153_v54 = vpack.c.bf16 %v152_v53, %v151_v51 }
 0x2c4   :  { %330 = vrot.lane.b32.xlu0 %v153_v54, %s496_s30  ;;  %435 = vmatpush3.bf16.msra.mxu1 %v153_v54 }
 0x2c5   :  { %446 = vmatprep.subr.bf16.mxu1 %v494_v1 }
 0x2ca   :  { %v465_v55 = vpop.eup %464 }
 0x2cb   :  { %v323_v56 = vsel %vm39_vm1, %v465_v55, 0.0 }
 0x2cc   :  { %324 = vadd.xlane.f32.xlu1 %v323_v56 }
 0x2e6   :  { %v217_v57 = vpop.xlane.xlu0 %216 }
 0x2e7   :  { %466 = vrcp.f32 %v217_v57 }
 0x2f1   :  { %v467_v58 = vpop.eup %466 }
 0x2f2   :  { %v219_v59 = vmul.f32 %v467_v58, %v463_v43 }
 0x2f4   :  { %v220_v60 = vpack.c.bf16 %v219_v59, %v219_v59 }
 0x2f6   :  { %437 = vmatmul.mubr.msk.bf16.vlgmr.msra.gmra.mrb[4].mxu1 %vm39_vm1, %v220_v60 }
 0x2f7   :  { %448 = vmatprep.mubr.msk.bf16.mxu1 %vm495_vm0, %v494_v1 }
 0x336   :  { %v331_v61 = vpop.permute.xlu0 %330 }
 0x337   :  { %447 = vmatpush3.bf16.msra.mxu1 %v331_v61 }
 0x359   :  { %v325_v62 = vpop.xlane.xlu1 %324 }
 0x35a   :  { %468 = vrcp.f32 %v325_v62 }
 0x364   :  { %v469_v63 = vpop.eup %468 }
 0x365   :  { %v327_v0 = vmul.f32 %v469_v63, %v465_v55 }
 0x367   :  { %v328_v2 = vpack.c.bf16 %v327_v0, %v327_v0 }
 0x369   :  { %449 = vmatmul.mubr.msk.bf16.vlgmr.msra.gmra.mrb[8].mxu1 %vm39_vm1, %v328_v2 }
 0x3c9   :  { %v258_v3 = vpop.f32.mrb[4].mxu1 }
 0x3ca   :  { %v438_v4 = vpop.f32.mrb[5].mxu1 }
 0x3cb   :  { %v261_v5 = vpop.f32.mrb[6].mxu1 }
 0x3cc   :  { %v439_v6 = vpop.f32.mrb[7].mxu1 }
 0x43c   :  { %v370_v7 = vpop.f32.mrb[8].mxu1 }
 0x43d   :  { %377 = vrot.lane.b32.xlu1 %v370_v7, %s498_s6  ;;  %v450_v8 = vpop.f32.mrb[9].mxu1 }
 0x43e   :  { %v373_v9 = vpop.f32.mrb[10].mxu1 }
 0x43f   :  { %v451_v10 = vpop.f32.mrb[11].mxu1 }
 0x4af   :  { %v378_v1 = vpop.permute.xlu1 %377 }
 0x4b0   :  { %v380_v11 = vsel %vm161_vm2, %v258_v3, %v378_v1 }
 0x4b1   :  { %381 = vst.msk [vmem:[#allocation2] sm:$0xff] %vm39_vm1, %v380_v11 }
 0x4b2   :  { %481 = shalt.err (!%p478_p4)
}
 0x4b3   :  { %s482_s21 = scalar_lea.hbm %s624_s7, 128 }
 0x4b4   :  { %p483_p5 = scmp.ne.s32.totalorder %s624_s7, %s482_s21  ;;  %p486_p6 = scmp.lt.u32.totalorder %s482_s21, %s624_s7 }
 0x4b6   :  { %p488_p7 = pnand %p486_p6, %p483_p5 }
 0x4b8   :  { %491 = shalt.err (!%p488_p7)
}
 0x4b9   :  { %391 = dma.vmem_to_hbm [thread:$0]  %s389_s17, 128, %s624_s7, [#allocation3]  }
 0x4ba   :  { %492 = dma.done.wait [#allocation3], 128  }
 0x4bb   :  { %493 = vsyncadd [#allocation3], 4294967168 }
 0x4bc   :  { %395 = vsyncpa [#allocation3], 1 }

</bundles_post_ra>
